<compile_context>
chip_gen: v7x
topology: tpu7x:2x2x1
jax: 0.10.0
libtpu: 0.0.40
codegen_flags: <defaults>
</compile_context>

<pallas_src>
import functools
import math

import jax
import jax.numpy as jnp
from jax import lax
from jax.experimental import pallas as pl
from jax.experimental.pallas import tpu as pltpu


def _round_up(x, m):
    return ((x + m - 1) // m) * m


def _round_down(x, m):
    return (x // m) * m


@functools.lru_cache(maxsize=None)
def _vmem_limit_bytes():
    """Generation-aware scoped-VMEM limit (v5e/v6e: 128 MiB, v7x: 64 MiB)."""
    try:
        cap = int(pltpu.get_tpu_info().vmem_capacity_bytes)
    except Exception:
        cap = 64 * 1024 * 1024                   # conservative default (v7x)
    return min((cap * 3) // 4, 112 * 1024 * 1024)


def _spec(block_shape, index_map, *, single_buffer):
    """BlockSpec; grid-invariant operands get a single VMEM buffer instead of
    the default double buffer (their index_map is constant, so the second
    buffer is pure wasted VMEM)."""
    if single_buffer:
        return pl.BlockSpec(block_shape, index_map,
                            pipeline_mode=pl.Buffered(1))
    return pl.BlockSpec(block_shape, index_map)


# ---------------------------------------------------------------------------
# Matmul path: 1x1 convs (module default) and the stride>1 im2col fallback.
# ---------------------------------------------------------------------------

def _matmul_bn_kernel(x_ref, w_ref, shift_ref, o_ref, acc_ref, *, relu):
    # x_ref:     (1, TK, T)  input columns for one (batch, spatial, K) tile
    # w_ref:     (C_out, TK) BN-scale-folded conv weight slice
    # shift_ref: (C_out, 1)  f32: beta + (bias - mean) * scale
    # o_ref:     (1, C_out, T)
    # acc_ref:   (C_out, T)  f32 accumulator, resident across the K grid axis
    @pl.when(pl.program_id(2) == 0)
    def _():
        acc_ref[...] = jnp.zeros_like(acc_ref)

    acc_ref[...] += jnp.dot(w_ref[...], x_ref[0],
                            preferred_element_type=jnp.float32)

    @pl.when(pl.program_id(2) == pl.num_programs(2) - 1)
    def _():
        y = acc_ref[...] + shift_ref[...]
        if relu:
            y = jnp.maximum(y, 0.0)
        o_ref[0] = y.astype(o_ref.dtype)


def _matmul_path(xcols, w2d, shift, *, relu, out_dtype):
    """out[n, co, q] = sum_k w2d[co, k] * xcols[n, k, q] + shift[co]."""
    N, K, Q = xcols.shape
    C_out = w2d.shape[0]
    isz = xcols.dtype.itemsize
    wsz = w2d.dtype.itemsize
    osz = jnp.dtype(out_dtype).itemsize

    vmem_limit = _vmem_limit_bytes()
    budget = (vmem_limit * 4) // 5

    # Contraction (K) tiling: only when K is large and a clean divisor exists.
    tk = K
    if K > 2048:
        for cand in range(2048, 0, -128):
            if K % cand == 0:
                tk = cand
                break
    n_k = K // tk

    # Lane-dense spatial tile T, accounting for double-buffered in/out blocks,
    # the (possibly single-buffered) weight block and the f32 accumulator.
    w_bytes = (1 if n_k == 1 else 2) * C_out * tk * wsz
    per_lane = 2 * tk * isz + 2 * C_out * osz + 12 * C_out
    t = max(budget - w_bytes, 0) // max(per_lane, 1)
    if Q <= 128:
        t = Q
    else:
        t = max(128, min(_round_down(t, 128), _round_down(Q, 128), 8192))
        if N == 1:                        # keep both v7x TensorCores busy
            t = min(t, _round_up(pl.cdiv(Q, 2), 128))
    n_sp = pl.cdiv(Q, t)

    kernel = functools.partial(_matmul_bn_kernel, relu=relu)

    def run(single_buffer):
        out = pl.pallas_call(
            kernel,
            out_shape=jax.ShapeDtypeStruct((N, C_out, Q), out_dtype),
            grid_spec=pltpu.PrefetchScalarGridSpec(
                num_scalar_prefetch=0,
                grid=(N, n_sp, n_k),
                in_specs=[
                    pl.BlockSpec((1, tk, t), lambda n, s, k: (n, k, s)),
                    _spec((C_out, tk), lambda n, s, k: (0, k),
                          single_buffer=single_buffer and n_k == 1),
                    _spec((C_out, 1), lambda n, s, k: (0, 0),
                          single_buffer=single_buffer),
                ],
                out_specs=pl.BlockSpec((1, C_out, t),
                                       lambda n, s, k: (n, 0, s)),
                scratch_shapes=[pltpu.VMEM((C_out, t), jnp.float32)],
            ),
            compiler_params=pltpu.CompilerParams(
                dimension_semantics=("parallel", "parallel", "arbitrary"),
                vmem_limit_bytes=vmem_limit,
            ),
        )(xcols, w2d, shift)
        return jax.block_until_ready(out)

    try:
        return run(True)
    except Exception:        # pl.Buffered(1) unsupported on this jax version
        return run(False)


# ---------------------------------------------------------------------------
# Halo-DMA tap-accumulation path: k>1 and stride==1 (PyramidBox 3x3 case).
# No im2col anywhere: the padded input stays in HBM; each grid step DMAs one
# row-tile + halo and accumulates kh*kw shifted-window matmuls.
# ---------------------------------------------------------------------------

def _tap_bn_kernel(x_hbm, w_ref, shift_ref, o_ref, xbuf, sem, *,
                   relu, taps, wp, t_flat, dma_len):
    # x_hbm:     (N, C_in, L)         padded + row-flattened input, in HBM
    # w_ref:     (kh*kw, C_out, C_in) per-tap BN-folded weights
    # shift_ref: (C_out, 1)           f32
    # o_ref:     (1, C_out, t_flat)   flat output tile (row period = wp)
    # xbuf:      (C_in, dma_len)      VMEM halo tile
    n = pl.program_id(0)
    s = pl.program_id(1)
    q0 = pl.multiple_of(s * t_flat, math.gcd(t_flat, 128))
    cp = pltpu.make_async_copy(x_hbm.at[n, :, pl.ds(q0, dma_len)],
                               xbuf, sem.at[0])
    cp.start()
    cp.wait()
    # TODO(synk): double-buffer this halo DMA across grid steps to hide its
    # latency (needs "arbitrary" grid semantics); weights and outputs are
    # still pipelined by BlockSpec and HBM traffic is already minimal.

    acc = None
    for t, (i, j) in enumerate(taps):
        sh = i * wp + j
        part = jnp.dot(w_ref[t], xbuf[:, sh:sh + t_flat],
                       preferred_element_type=jnp.float32)
        acc = part if acc is None else acc + part
    y = acc + shift_ref[...]
    if relu:
        y = jnp.maximum(y, 0.0)
    o_ref[0] = y.astype(o_ref.dtype)


def _tap_path(x, w4d, shift, *, relu, out_dtype, padding, kh, kw):
    N, C_in, H, W = x.shape
    C_out = w4d.shape[0]
    p = padding
    H_out = H + 2 * p - kh + 1
    W_out = W + 2 * p - kw + 1
    wp = _round_up(W + 2 * p, 8)         # flat row period (right cols garbage)

    isz = x.dtype.itemsize
    wsz = w4d.dtype.itemsize
    osz = jnp.dtype(out_dtype).itemsize
    vmem_limit = _vmem_limit_bytes()
    budget = (vmem_limit * 4) // 5

    # Output rows per spatial tile, sized against everything resident in VMEM:
    # halo input buffer, per-tap slice temp, f32 accumulator/epilogue,
    # double-buffered output block, single-buffered per-tap weights.
    per_row = wp * (C_in * isz + 4 * C_in + 2 * C_out * osz + 8 * C_out)
    const = kh * kw * C_out * C_in * wsz + C_in * kh * wp * isz + (1 << 16)
    th = max(budget - const, 0) // max(per_row, 1)
    th = min(th, max(1, 8192 // wp))     # keep output tiles lane-reasonable
    if th >= H_out:
        th = H_out
        if N == 1 and H_out >= 32:       # >=2 spatial tiles for v7x megacore
            th = _round_up(pl.cdiv(H_out, 2), 16)
    else:
        th = max(16, _round_down(th, 16))   # keeps t_flat a multiple of 128
    n_sp = pl.cdiv(H_out, th)
    t_flat = th * wp
    dma_len = t_flat + (kh - 1) * wp + (kw - 1)

    # One pad pass only: conv padding, plus bottom rows covering the last
    # tile's halo and right columns up to the row period.  The reshape to the
    # flat row-major layout is free (contiguous).
    rows_total = n_sp * th + kh - 1 + (1 if kw > 1 else 0)
    xp = jnp.pad(x, ((0, 0), (0, 0),
                     (p, rows_total - H - p),
                     (p, wp - W - p)))
    x_flat = xp.reshape(N, C_in, rows_total * wp)

    w_taps = jnp.transpose(w4d, (2, 3, 0, 1)).reshape(kh * kw, C_out, C_in)
    taps = tuple((i, j) for i in range(kh) for j in range(kw))

    kernel = functools.partial(_tap_bn_kernel, relu=relu, taps=taps, wp=wp,
                               t_flat=t_flat, dma_len=dma_len)

    def run(single_buffer):
        out = pl.pallas_call(
            kernel,
            out_shape=jax.ShapeDtypeStruct((N, C_out, n_sp * t_flat),
                                           out_dtype),
            grid_spec=pltpu.PrefetchScalarGridSpec(
                num_scalar_prefetch=0,
                grid=(N, n_sp),
                in_specs=[
                    pl.BlockSpec(memory_space=pl.ANY),   # input stays in HBM
                    _spec((kh * kw, C_out, C_in), lambda n, s: (0, 0, 0),
                          single_buffer=single_buffer),
                    _spec((C_out, 1), lambda n, s: (0, 0),
                          single_buffer=single_buffer),
                ],
                out_specs=pl.BlockSpec((1, C_out, t_flat),
                                       lambda n, s: (n, 0, s)),
                scratch_shapes=[
                    pltpu.VMEM((C_in, dma_len), x.dtype),
                    pltpu.SemaphoreType.DMA((1,)),
                ],
            ),
            compiler_params=pltpu.CompilerParams(
                dimension_semantics=("parallel", "parallel"),
                vmem_limit_bytes=vmem_limit,
            ),
        )(x_flat, w_taps, shift)
        return jax.block_until_ready(out)

    try:
        out_flat = run(True)
    except Exception:        # pl.Buffered(1) unsupported on this jax version
        out_flat = run(False)

    out = out_flat[:, :, :H_out * wp].reshape(N, C_out, H_out, wp)
    return out[:, :, :, :W_out]


# ---------------------------------------------------------------------------
# Wrapper with the BN/bias fold and path selection.
# ---------------------------------------------------------------------------

def _im2col(x, kh, kw, stride, padding):
    """Patch extraction with (C_in-major, (kh,kw) row-major) ordering to match
    PyTorch's weight.reshape(C_out, C_in*kh*kw).  Only used for stride > 1."""
    N, C, H, W = x.shape
    H_out = (H + 2 * padding - kh) // stride + 1
    W_out = (W + 2 * padding - kw) // stride + 1
    xp = jnp.pad(x, ((0, 0), (0, 0), (padding, padding), (padding, padding)))
    cols = []
    for i in range(kh):
        for j in range(kw):
            cols.append(xp[:, :,
                           i: i + stride * (H_out - 1) + 1: stride,
                           j: j + stride * (W_out - 1) + 1: stride])
    patches = jnp.stack(cols, axis=2)                # (N, C, kh*kw, Ho, Wo)
    patches = patches.reshape(N, C * kh * kw, H_out * W_out)
    return patches, H_out, W_out


def convbn(x, conv_w, conv_b, gamma, beta, running_mean, running_var, *,
           stride=1, padding=0, relu=False, eps=1e-5, compute_dtype=None):
    """ConvBN forward, PyTorch eval() semantics (running statistics).

    x: (N, C_in, H, W); conv_w: (C_out, C_in, kh, kw).  compute_dtype=bf16
    optionally halves HBM/VMEM traffic (matmuls still accumulate in f32)."""
    # TODO(synk): training-mode BatchNorm (batch statistics) not implemented.
    N, C_in, H, W = x.shape
    C_out, _, kh, kw = conv_w.shape
    out_dtype = x.dtype
    cdt = jnp.dtype(compute_dtype) if compute_dtype is not None else x.dtype

    # Fold conv bias + inference BN into the weight (scale) and a per-channel
    # f32 shift, so the kernel epilogue is just `acc + shift` (+ ReLU).
    inv_std = lax.rsqrt(running_var.astype(jnp.float32) + eps)
    scale = gamma.astype(jnp.float32) * inv_std
    shift = (beta.astype(jnp.float32)
             + (conv_b.astype(jnp.float32) - running_mean.astype(jnp.float32))
             * scale).reshape(C_out, 1)
    w_scaled = (conv_w.astype(jnp.float32)
                * scale[:, None, None, None]).astype(cdt)
    x_c = x.astype(cdt)

    if stride == 1 and (kh, kw) == (1, 1) and padding == 0:
        # Module default (1x1): free reshape, no pad/slice passes at all.
        out = _matmul_path(x_c.reshape(N, C_in, H * W),
                           w_scaled.reshape(C_out, C_in), shift,
                           relu=relu, out_dtype=out_dtype)
        return out.reshape(N, C_out, H, W)

    if stride == 1:
        return _tap_path(x_c, w_scaled, shift, relu=relu, out_dtype=out_dtype,
                         padding=padding, kh=kh, kw=kw)

    # TODO(synk): stride > 1 falls back to wrapper im2col (kh*kw x HBM traffic
    # inflation); PyramidBox's ConvBN only uses stride 1, so left unoptimized.
    patches, H_out, W_out = _im2col(x_c, kh, kw, stride, padding)
    out = _matmul_path(patches, w_scaled.reshape(C_out, C_in * kh * kw), shift,
                       relu=relu, out_dtype=out_dtype)
    return out.reshape(N, C_out, H_out, W_out)


def _ref_convbn(x, conv_w, conv_b, gamma, beta, mean, var,
                *, stride, padding, relu, eps=1e-5):
    y = lax.conv_general_dilated(
        x.astype(jnp.float32), conv_w.astype(jnp.float32),
        window_strides=(stride, stride),
        padding=[(padding, padding), (padding, padding)],
        dimension_numbers=("NCHW", "OIHW", "NCHW"))
    y = y + conv_b.reshape(1, -1, 1, 1)
    y = (y - mean.reshape(1, -1, 1, 1)) / jnp.sqrt(var.reshape(1, -1, 1, 1) + eps)
    y = y * gamma.reshape(1, -1, 1, 1) + beta.reshape(1, -1, 1, 1)
    if relu:
        y = jnp.maximum(y, 0.0)
    return y


if __name__ == "__main__":
    key = jax.random.PRNGKey(0)
    N, C_in, H, W = 2, 4, 16, 16

    def run_case(case_key, C_out, k, stride, padding, relu,
                 compute_dtype=None, atol=1e-3):
        ks = jax.random.split(case_key, 7)
        x = jax.random.normal(ks[0], (N, C_in, H, W), dtype=jnp.float32)
        conv_w = 0.1 * jax.random.normal(ks[1], (C_out, C_in, k, k),
                                         dtype=jnp.float32)
        conv_b = 0.1 * jax.random.normal(ks[2], (C_out,), dtype=jnp.float32)
        gamma = 1.0 + 0.1 * jax.random.normal(ks[3], (C_out,), dtype=jnp.float32)
        beta = 0.1 * jax.random.normal(ks[4], (C_out,), dtype=jnp.float32)
        mean = 0.1 * jax.random.normal(ks[5], (C_out,), dtype=jnp.float32)
        var = jax.random.uniform(ks[6], (C_out,), dtype=jnp.float32,
                                 minval=0.5, maxval=1.5)

        out = convbn(x, conv_w, conv_b, gamma, beta, mean, var,
                     stride=stride, padding=padding, relu=relu,
                     compute_dtype=compute_dtype)
        out = jax.block_until_ready(out)
        ref = _ref_convbn(x, conv_w, conv_b, gamma, beta, mean, var,
                          stride=stride, padding=padding, relu=relu)
        assert out.shape == ref.shape, (out.shape, ref.shape)
        err = float(jnp.max(jnp.abs(out.astype(jnp.float32) - ref)))
        assert err < atol, f"mismatch: max abs err {err}"

    k1, k2, k3, k4 = jax.random.split(key, 4)
    # Module default: 1x1 conv, stride 1, no padding, no relu (matmul path).
    run_case(k1, C_out=8, k=1, stride=1, padding=0, relu=False)
    # 3x3 conv, padding 1, relu: halo-DMA tap-accumulation path (no im2col).
    run_case(k2, C_out=8, k=3, stride=1, padding=1, relu=True)
    # Strided conv exercises the im2col fallback path.
    run_case(k3, C_out=8, k=3, stride=2, padding=1, relu=True)
    # Optional bf16 compute (halves HBM/VMEM traffic on v6e/v7x).
    run_case(k4, C_out=8, k=1, stride=1, padding=0, relu=True,
             compute_dtype=jnp.bfloat16, atol=5e-2)

    print("KERNEL_OK")
</pallas_src>

<mosaic_0001>
module attributes {stable_mosaic.version = 11 : i64} {
  func.func @_matmul_bn_kernel(%arg0: i32, %arg1: i32, %arg2: i32, %arg3: memref<1x4x256xf32, #tpu.memory_space<vmem>>, %arg4: memref<8x4xf32, #tpu.memory_space<vmem>>, %arg5: memref<8x1xf32, #tpu.memory_space<vmem>>, %arg6: memref<1x8x256xf32, #tpu.memory_space<vmem>>, %arg7: memref<8x256xf32, #tpu.memory_space<vmem>>) attributes {dimension_semantics = [#tpu.dimension_semantics<parallel>, #tpu.dimension_semantics<parallel>, #tpu.dimension_semantics<arbitrary>], iteration_bounds = array<i64: 2, 1, 1>, scalar_prefetch = 0 : i64, scratch_operands = 1 : i64, tpu.core_type = #tpu.core_type<tc>, window_params = [{transform_indices = @transform_0, window_bounds = array<i64: 1, 4, 256>}, {pipeline_mode = #tpu.pipeline_mode<synchronous>, transform_indices = @transform_1, window_bounds = array<i64: 8, 4>}, {pipeline_mode = #tpu.pipeline_mode<synchronous>, transform_indices = @transform_2, window_bounds = array<i64: 8, 1>}, {transform_indices = @transform_3, window_bounds = array<i64: 1, 8, 256>}]} {
    %c0_i32 = arith.constant 0 : i32
    %0 = arith.cmpi eq, %arg2, %c0_i32 : i32
    %1 = arith.extui %0 : i1 to i32
    %c0_i32_0 = arith.constant 0 : i32
    %2 = arith.cmpi ne, %1, %c0_i32_0 : i32
    scf.if %2 {
      %cst_11 = arith.constant 0.000000e+00 : f32
      %13 = vector.broadcast %cst_11 : f32 to vector<8x256xf32>
      %c0_12 = arith.constant 0 : index
      %c0_13 = arith.constant 0 : index
      %14 = vector.load %arg7[%c0_12, %c0_13] : memref<8x256xf32, #tpu.memory_space<vmem>>, vector<8x256xf32>
      tpu.vector_store %arg7[%c0_12, %c0_13], %13 {strides = array<i32>} : memref<8x256xf32, #tpu.memory_space<vmem>>, vector<8x256xf32>,
    } else {
    }
    %c0 = arith.constant 0 : index
    %c0_1 = arith.constant 0 : index
    %3 = vector.load %arg7[%c0, %c0_1] : memref<8x256xf32, #tpu.memory_space<vmem>>, vector<8x256xf32>
    %c0_2 = arith.constant 0 : index
    %c0_3 = arith.constant 0 : index
    %4 = vector.load %arg4[%c0_2, %c0_3] : memref<8x4xf32, #tpu.memory_space<vmem>>, vector<8x4xf32>
    %c0_4 = arith.constant 0 : index
    %c0_5 = arith.constant 0 : index
    %c0_6 = arith.constant 0 : index
    %5 = vector.load %arg3[%c0_4, %c0_5, %c0_6] : memref<1x4x256xf32, #tpu.memory_space<vmem>>, vector<1x4x256xf32>
    %6 = vector.shape_cast %5 : vector<1x4x256xf32> to vector<4x256xf32>
    %cst = arith.constant dense<0.000000e+00> : vector<8x256xf32>
    %7 = tpu.matmul %4, %6, %cst {dimension_numbers = #tpu.dot_dimension_numbers<[1], [0], [0], [1], [0, 0, 1, 1], [], []>} : vector<8x4xf32>, vector<4x256xf32>, vector<8x256xf32> -> vector<8x256xf32>
    %8 = arith.addf %3, %7 : vector<8x256xf32>
    %c0_7 = arith.constant 0 : index
    %c0_8 = arith.constant 0 : index
    %9 = vector.load %arg7[%c0_7, %c0_8] : memref<8x256xf32, #tpu.memory_space<vmem>>, vector<8x256xf32>
    tpu.vector_store %arg7[%c0_7, %c0_8], %8 {strides = array<i32>} : memref<8x256xf32, #tpu.memory_space<vmem>>, vector<8x256xf32>,
    %c0_i32_9 = arith.constant 0 : i32
    %10 = arith.cmpi eq, %arg2, %c0_i32_9 : i32
    %11 = arith.extui %10 : i1 to i32
    %c0_i32_10 = arith.constant 0 : i32
    %12 = arith.cmpi ne, %11, %c0_i32_10 : i32
    scf.if %12 {
      %c0_11 = arith.constant 0 : index
      %c0_12 = arith.constant 0 : index
      %13 = vector.load %arg7[%c0_11, %c0_12] : memref<8x256xf32, #tpu.memory_space<vmem>>, vector<8x256xf32>
      %c0_13 = arith.constant 0 : index
      %c0_14 = arith.constant 0 : index
      %14 = vector.load %arg5[%c0_13, %c0_14] : memref<8x1xf32, #tpu.memory_space<vmem>>, vector<8x1xf32>
      %15 = vector.broadcast %14 : vector<8x1xf32> to vector<8x256xf32>
      %16 = arith.addf %13, %15 : vector<8x256xf32>
      %c0_15 = arith.constant 0 : index
      %c0_16 = arith.constant 0 : index
      %c0_17 = arith.constant 0 : index
      %17 = vector.load %arg6[%c0_15, %c0_16, %c0_17] : memref<1x8x256xf32, #tpu.memory_space<vmem>>, vector<1x8x256xf32>
      %18 = vector.shape_cast %17 : vector<1x8x256xf32> to vector<8x256xf32>
      %19 = vector.shape_cast %16 : vector<8x256xf32> to vector<1x8x256xf32>
      tpu.vector_store %arg6[%c0_15, %c0_16, %c0_17], %19 {strides = array<i32>} : memref<1x8x256xf32, #tpu.memory_space<vmem>>, vector<1x8x256xf32>,
    } else {
    }
    return
  }
  func.func @transform_0(%arg0: i32, %arg1: i32, %arg2: i32) -> (i32, i32, i32) {
    %c0_i32 = arith.constant 0 : i32
    return %arg0, %arg2, %arg1 : i32, i32, i32
  }
  func.func @transform_1(%arg0: i32, %arg1: i32, %arg2: i32) -> (i32, i32) {
    %c0_i32 = arith.constant 0 : i32
    %c0_i32_0 = arith.constant 0 : i32
    return %c0_i32, %arg2 : i32, i32
  }
  func.func @transform_2(%arg0: i32, %arg1: i32, %arg2: i32) -> (i32, i32) {
    %c0_i32 = arith.constant 0 : i32
    %c0_i32_0 = arith.constant 0 : i32
    %c0_i32_1 = arith.constant 0 : i32
    return %c0_i32, %c0_i32_0 : i32, i32
  }
  func.func @transform_3(%arg0: i32, %arg1: i32, %arg2: i32) -> (i32, i32, i32) {
    %c0_i32 = arith.constant 0 : i32
    %c0_i32_0 = arith.constant 0 : i32
    return %arg0, %c0_i32, %arg1 : i32, i32, i32
  }
}

module attributes {stable_mosaic.version = 11 : i64} {
  func.func @_matmul_bn_kernel(%arg0: i32, %arg1: i32, %arg2: i32, %arg3: memref<1x4x256xf32, #tpu.memory_space<vmem>>, %arg4: memref<8x4xf32, #tpu.memory_space<vmem>>, %arg5: memref<8x1xf32, #tpu.memory_space<vmem>>, %arg6: memref<1x8x256xf32, #tpu.memory_space<vmem>>, %arg7: memref<8x256xf32, #tpu.memory_space<vmem>>) attributes {dimension_semantics = [#tpu.dimension_semantics<parallel>, #tpu.dimension_semantics<parallel>, #tpu.dimension_semantics<arbitrary>], iteration_bounds = array<i64: 2, 1, 1>, scalar_prefetch = 0 : i64, scratch_operands = 1 : i64, tpu.core_type = #tpu.core_type<tc>, window_params = [{transform_indices = @transform_0, window_bounds = array<i64: 1, 4, 256>}, {transform_indices = @transform_1, window_bounds = array<i64: 8, 4>}, {pipeline_mode = #tpu.pipeline_mode<synchronous>, transform_indices = @transform_2, window_bounds = array<i64: 8, 1>}, {transform_indices = @transform_3, window_bounds = array<i64: 1, 8, 256>}]} {
    %c0_i32 = arith.constant 0 : i32
    %0 = arith.cmpi eq, %arg2, %c0_i32 : i32
    %1 = arith.extui %0 : i1 to i32
    %c0_i32_0 = arith.constant 0 : i32
    %2 = arith.cmpi ne, %1, %c0_i32_0 : i32
    scf.if %2 {
      %cst_11 = arith.constant 0.000000e+00 : f32
      %13 = vector.broadcast %cst_11 : f32 to vector<8x256xf32>
      %c0_12 = arith.constant 0 : index
      %c0_13 = arith.constant 0 : index
      %14 = vector.load %arg7[%c0_12, %c0_13] : memref<8x256xf32, #tpu.memory_space<vmem>>, vector<8x256xf32>
      tpu.vector_store %arg7[%c0_12, %c0_13], %13 {strides = array<i32>} : memref<8x256xf32, #tpu.memory_space<vmem>>, vector<8x256xf32>,
    } else {
    }
    %c0 = arith.constant 0 : index
    %c0_1 = arith.constant 0 : index
    %3 = vector.load %arg7[%c0, %c0_1] : memref<8x256xf32, #tpu.memory_space<vmem>>, vector<8x256xf32>
    %c0_2 = arith.constant 0 : index
    %c0_3 = arith.constant 0 : index
    %4 = vector.load %arg4[%c0_2, %c0_3] : memref<8x4xf32, #tpu.memory_space<vmem>>, vector<8x4xf32>
    %c0_4 = arith.constant 0 : index
    %c0_5 = arith.constant 0 : index
    %c0_6 = arith.constant 0 : index
    %5 = vector.load %arg3[%c0_4, %c0_5, %c0_6] : memref<1x4x256xf32, #tpu.memory_space<vmem>>, vector<1x4x256xf32>
    %6 = vector.shape_cast %5 : vector<1x4x256xf32> to vector<4x256xf32>
    %cst = arith.constant dense<0.000000e+00> : vector<8x256xf32>
    %7 = tpu.matmul %4, %6, %cst {dimension_numbers = #tpu.dot_dimension_numbers<[1], [0], [0], [1], [0, 0, 1, 1], [], []>} : vector<8x4xf32>, vector<4x256xf32>, vector<8x256xf32> -> vector<8x256xf32>
    %8 = arith.addf %3, %7 : vector<8x256xf32>
    %c0_7 = arith.constant 0 : index
    %c0_8 = arith.constant 0 : index
    %9 = vector.load %arg7[%c0_7, %c0_8] : memref<8x256xf32, #tpu.memory_space<vmem>>, vector<8x256xf32>
    tpu.vector_store %arg7[%c0_7, %c0_8], %8 {strides = array<i32>} : memref<8x256xf32, #tpu.memory_space<vmem>>, vector<8x256xf32>,
    %c0_i32_9 = arith.constant 0 : i32
    %10 = arith.cmpi eq, %arg2, %c0_i32_9 : i32
    %11 = arith.extui %10 : i1 to i32
    %c0_i32_10 = arith.constant 0 : i32
    %12 = arith.cmpi ne, %11, %c0_i32_10 : i32
    scf.if %12 {
      %c0_11 = arith.constant 0 : index
      %c0_12 = arith.constant 0 : index
      %13 = vector.load %arg7[%c0_11, %c0_12] : memref<8x256xf32, #tpu.memory_space<vmem>>, vector<8x256xf32>
      %c0_13 = arith.constant 0 : index
      %c0_14 = arith.constant 0 : index
      %14 = vector.load %arg5[%c0_13, %c0_14] : memref<8x1xf32, #tpu.memory_space<vmem>>, vector<8x1xf32>
      %15 = vector.broadcast %14 : vector<8x1xf32> to vector<8x256xf32>
      %16 = arith.addf %13, %15 : vector<8x256xf32>
      %c0_15 = arith.constant 0 : index
      %c0_16 = arith.constant 0 : index
      %c0_17 = arith.constant 0 : index
      %17 = vector.load %arg6[%c0_15, %c0_16, %c0_17] : memref<1x8x256xf32, #tpu.memory_space<vmem>>, vector<1x8x256xf32>
      %18 = vector.shape_cast %17 : vector<1x8x256xf32> to vector<8x256xf32>
      %19 = vector.shape_cast %16 : vector<8x256xf32> to vector<1x8x256xf32>
      tpu.vector_store %arg6[%c0_15, %c0_16, %c0_17], %19 {strides = array<i32>} : memref<1x8x256xf32, #tpu.memory_space<vmem>>, vector<1x8x256xf32>,
    } else {
    }
    return
  }
  func.func @transform_0(%arg0: i32, %arg1: i32, %arg2: i32) -> (i32, i32, i32) {
    %c0_i32 = arith.constant 0 : i32
    return %arg0, %arg2, %arg1 : i32, i32, i32
  }
  func.func @transform_1(%arg0: i32, %arg1: i32, %arg2: i32) -> (i32, i32) {
    %c0_i32 = arith.constant 0 : i32
    %c0_i32_0 = arith.constant 0 : i32
    return %c0_i32, %arg2 : i32, i32
  }
  func.func @transform_2(%arg0: i32, %arg1: i32, %arg2: i32) -> (i32, i32) {
    %c0_i32 = arith.constant 0 : i32
    %c0_i32_0 = arith.constant 0 : i32
    %c0_i32_1 = arith.constant 0 : i32
    return %c0_i32, %c0_i32_0 : i32, i32
  }
  func.func @transform_3(%arg0: i32, %arg1: i32, %arg2: i32) -> (i32, i32, i32) {
    %c0_i32 = arith.constant 0 : i32
    %c0_i32_0 = arith.constant 0 : i32
    return %arg0, %c0_i32, %arg1 : i32, i32, i32
  }
}

</mosaic_0001>

<bundles_post_ra>
// kernel: tpu_custom_call.1
= control target key start
LH: loop header
LB: loop body
LE: loop exit
PB: predicated region body
PF: predicated region fallthrough
CT: control target
= control target key end

     0   :  { %8 = vsyncpa [#allocation4], 0  ;;  %s765_s0 = inlined_call_operand.vmem [shape: f32[2,4,256], index: 0, kind: input, shape index: {}]   ;;  %s766_s1 = inlined_call_operand.vmem [shape: f32[8,4], index: 1, kind: input, shape index: {}]   ;;  %s767_s2 = inlined_call_operand.vmem [shape: f32[8,1], index: 2, kind: input, shape index: {}]   ;;  %s768_s3 = inlined_call_operand.hbm [shape: f32[2,8,256], index: 3, kind: output, shape index: {}]  }
   0x1   :  { %10 = vsyncpa [#allocation4 + $0x1], 0  ;;  %s647_s12 = smov 0   ;;  %s649_s13 = smov 0  }
   0x2   :  { %s651_s14 = smov 0   ;;  %s653_s15 = smov 0  }
   0x3   :  { %s655_s16 = smov 0   ;;  %s657_s17 = smov 0  }
   0x4 LB: > { %s466_s18 = sadd.s32 4294967295, %s622_s17   ;;  %s467_s19 = sadd.s32 4294967294, %s622_s17   ;;  %s622_s17 = sphi %s657_s17, %s16_s17   ;;  %s618_s16 = sphi %s655_s16, %s775_s16   ;;  %s614_s15 = sphi %s653_s15, %s774_s15   ;;  %s610_s14 = sphi %s651_s14, %s773_s14   ;;  %s606_s13 = sphi %s649_s13, %s772_s13   ;;  %s602_s12 = sphi %s647_s12, %s771_s12  }
   0x5   : > { %s35_s20 = sadd.s32 1, %s618_s16  ;;  %s121_s21 = sadd.s32 1, %s610_s14 }
   0x6   : > { %p37_p0 = scmp.ge.s32.totalorder %s35_s20, 2  ;;  %p131_p1 = scmp.ne.s32.totalorder %s610_s14, %s606_s13 }
   0x7   : > { %p132_p2 = scmp.eq.s32.totalorder %s466_s18, 1  ;;  %p137_p3 = scmp.ne.s32.totalorder %s606_s13, %s602_s12 }
   0x8   : > { %s777_s20 = smov (%p37_p0, %s35_s20), 0  ;;  %p138_p5 = scmp.eq.s32.totalorder %s467_s19, 1 }
   0x9   : > { %p687_p4 = por %p132_p2, %p131_p1  ;;  %s116_s23 = ssub.s32 %s618_s16, %s777_s20 }
   0xa   : > { %p471_p6 = scmp.ge.s32.totalorder %s622_s17, 1  ;;  %p119_p7 = scmp.eq.s32.totalorder %s116_s23, 0 }
   0xb   : > { %p694_p8 = por %p138_p5, %p137_p3  ;;  %p183_p9 = scmp.lt.s32.totalorder %s622_s17, 3 }
   0xc   : > { %s700_s25 = scalar_select %p119_p7, %s610_s14, %s121_s21  }
   0xd   : > { %p184_p10 = pnand %p471_p6, %p183_p9 }
   0xe   : > { %p220_p11 = scmp.lt.s32.totalorder (!%p184_p10), %s614_s15, 1  ;;  %v624_v0 = vmov (!%p184_p10), 0.0   ;;  %v625_v1 = vmov (!%p184_p10), 0   ;;  %v339_v2 = vld [vmem:[%s767_s2] sm:$0xff] (!%p184_p10)  ;;  %vm254_vm0 = vcmask (!%p184_p10), 1043456   ;;  %vm250_vm1 = vcmask (!%p184_p10), 31744  }
   0xf   : > { %187 = sbr.rel (%p184_p10) target bundleno = 260 (0x104), region = 32  ;;  %323 = vmatprep.mubr.f32.mxu0 (!%p184_p10), %v624_v0  ;;  %542 = vset.pattern.permute.xlu0 (!%p184_p10), %v625_v1  ;;  %v246_v5 = vld [vmem:[%s766_s1] sm:$0xff] (!%p184_p10)  ;;  %s216_s8 = sand.u32 (!%p184_p10), 1, %s606_s13  }
  0x10   : > { %342 = vperm.xlu0 (!%p184_p10), %542, %v339_v2   ;;  %s472_s9 = sshll.u32 (!%p184_p10), %s216_s8, 4  ;;  %s484_s10 = sshll.u32 (!%p184_p10), %s614_s15, 8 }
  0x11   : > { %s218_s11 = scalar_lea.vmem (!%p184_p10), [#allocation3], %s472_s9  ;;  %s718_s23 = scalar_lea.hbm (!%p184_p10), %s768_s3, %s484_s10 }
  0x12   : > { %s366_s18 = sshll.u32 (!%p184_p10), %s218_s11, 4  ;;  %s350_s26 = scalar_lea.sflag (!%p184_p10), [#allocation4], %s216_s8  ;;  %s720_s18 = int_to_ptr.vmem [resolvable:$true] %s366_s18 }
  0x13   : > { %s626_s27 = smov (!%p184_p10), [#allocation3]  }
  0x16   : > { %s221_s28 = scalar_select %p220_p11, %s614_s15, 1 }
  0x17   : > { %s544_s15 = scalar_lea.vmem %s720_s18, 256 }
  0x18   : > { %s483_s29 = sshll.u32 %s221_s28, 3  ;;  %p545_p12 = scmp.ne.s32.totalorder %s720_s18, %s544_s15 }
  0x19   : > { %s231_s5 = scalar_lea.vmem %s765_s0, %s483_s29  ;;  %s548_s28 = sshll.u32 %s626_s27, 4  ;;  %s549_s28 = int_to_ptr.vmem [resolvable:$false] %s548_s28 }
  0x1a   : > { %v247_v3 = vld [vmem:[%s231_s5] sm:$0xff]  ;;  %p546_p13 = pnand %p545_p12, %p687_p4  ;;  %s550_s29 = scalar_lea.vmem %s549_s28, 512 }
  0x1b   : > { %v249_v4 = vcombine.high %v247_v3, %v247_v3  ;;  %p551_p1 = scmp.lt.s32.totalorder %s720_s18, %s549_s28  ;;  %p552_p2 = scmp.lt.s32.totalorder %s550_s29, %s544_s15 }
  0x1c   : > { %p547_p0 = pneg %p546_p13 }
  0x1d   : > { %475 = vmatprep.subr.msk.mxu0 %vm254_vm0, %v249_v4  ;;  %p553_p3 = por %p552_p2, %p551_p1 }
  0x1e   : > { %476 = vmatpush1.msk.msra.mxu0 %vm254_vm0, %v247_v3 }
  0x1f   : > { %477 = vmatmul.mubr.msk.f32.vlgmr.msra.gmra.mrb[0].mxu0 %vm250_vm1, %v246_v5  ;;  %p554_p5 = pnand %p553_p3, %p547_p0 }
  0x8f   : > { %v343_v6 = vpop.permute.xlu0 %342 }
  0xf2   : > { %v325_v7 = vpop.f32.mrb[0].mxu0 }
  0xf3   : > { %v345_v8 = vadd.f32 %v343_v6, %v325_v7  ;;  %v327_v9 = vpop.f32.mrb[1].mxu0 }
  0xf4   : > { %v346_v10 = vadd.f32 %v343_v6, %v327_v9 }
  0xf5   : > { %347 = vst [vmem:[%s218_s11] sm:$0xff] %v345_v8 }
  0xf6   : > { %348 = vst [vmem:[%s218_s11 + $0x8] sm:$0xff] %v346_v10 }
  0xf7   : > { %557 = shalt.err (!%p554_p5)
}
  0xf8   : > { %s558_s30 = scalar_lea.hbm %s718_s23, 256  ;;  %s562_s6 = scalar_lea.hbm %s768_s3, 512 }
  0xf9   : > { %p559_p6 = scmp.ne.s32.totalorder %s718_s23, %s558_s30  ;;  %p563_p10 = scmp.lt.u32.totalorder %s718_s23, %s768_s3 }
  0xfa   : > { %p564_p11 = scmp.lt.u32.totalorder %s562_s6, %s558_s30  ;;  %p566_p13 = scmp.lt.u32.totalorder %s558_s30, %s718_s23 }
  0xfb   : > { %p560_p7 = pnand %p559_p6, %p687_p4 }
  0xfc   : > { %p565_p12 = por %p564_p11, %p563_p10 }
  0xfd   : > { %p561_p9 = pneg %p560_p7 }
  0xfe   : > { %p567_p0 = por %p566_p13, %p565_p12 }
 0x100   : > { %p568_p1 = pnand %p567_p0, %p561_p9 }
 0x102   : > { %571 = shalt.err (!%p568_p1)
}
 0x103   : > { %485 = dma.vmem_to_hbm [thread:$0]  (%p687_p4), %s720_s18, 256, %s718_s23, %s350_s26  }
 0x104 PF: > { %p491_p2 = scmp.ge.s32.totalorder %s622_s17, 2  ;;  %s378_s9 = sand.u32 1, %s602_s12  }
 0x105   : > { %s379_s10 = scalar_lea.sflag [#allocation4], %s378_s9 }
 0x106   : > { %p488_p3 = pnand %p491_p2, %p694_p8 }
 0x108   : > { %597 = dma.done.wait (!%p488_p3), %s379_s10, 256  }
 0x109   : > { %599 = vsyncadd (!%p488_p3), %s379_s10, 4294967040  ;;  %s16_s17 = sadd.s32 1, %s622_s17   ;;  %s771_s12 = smov %s606_s13 }
 0x10a   : > { %p13_p5 = scmp.ge.s32.totalorder %s16_s17, 4   ;;  %s772_s13 = smov %s610_s14 }
 0x10b   : > { %s773_s14 = smov %s700_s25  ;;  %s774_s15 = smov %s618_s16 }
 0x10c   : > { %s775_s16 = smov %s777_s20  ;;  %15 = sbr.rel (!%p13_p5) target bundleno = 4 (0x4), region = 78 }
 0x113   :  { %384 = vsyncpa [#allocation4], 1 }
 0x114   :  { %386 = vsyncpa [#allocation4 + $0x1], 1 }

// kernel: tpu_custom_call.1
= control target key start
LH: loop header
LB: loop body
LE: loop exit
PB: predicated region body
PF: predicated region fallthrough
CT: control target
= control target key end

     0   :  { %8 = vsyncpa [#allocation4], 0  ;;  %s765_s0 = inlined_call_operand.vmem [shape: f32[2,4,256], index: 0, kind: input, shape index: {}]   ;;  %s766_s1 = inlined_call_operand.vmem [shape: f32[8,4], index: 1, kind: input, shape index: {}]   ;;  %s767_s2 = inlined_call_operand.vmem [shape: f32[8,1], index: 2, kind: input, shape index: {}]   ;;  %s768_s3 = inlined_call_operand.hbm [shape: f32[2,8,256], index: 3, kind: output, shape index: {}]  }
   0x1   :  { %10 = vsyncpa [#allocation4 + $0x1], 0  ;;  %s647_s12 = smov 0   ;;  %s649_s13 = smov 0  }
   0x2   :  { %s651_s14 = smov 0   ;;  %s653_s15 = smov 0  }
   0x3   :  { %s655_s16 = smov 0   ;;  %s657_s17 = smov 0  }
   0x4 LB: > { %s466_s18 = sadd.s32 4294967295, %s622_s17   ;;  %s467_s19 = sadd.s32 4294967294, %s622_s17   ;;  %s622_s17 = sphi %s657_s17, %s16_s17   ;;  %s618_s16 = sphi %s655_s16, %s775_s16   ;;  %s614_s15 = sphi %s653_s15, %s774_s15   ;;  %s610_s14 = sphi %s651_s14, %s773_s14   ;;  %s606_s13 = sphi %s649_s13, %s772_s13   ;;  %s602_s12 = sphi %s647_s12, %s771_s12  }
   0x5   : > { %s35_s20 = sadd.s32 1, %s618_s16  ;;  %s121_s21 = sadd.s32 1, %s610_s14 }
   0x6   : > { %p37_p0 = scmp.ge.s32.totalorder %s35_s20, 2  ;;  %p131_p1 = scmp.ne.s32.totalorder %s610_s14, %s606_s13 }
   0x7   : > { %p132_p2 = scmp.eq.s32.totalorder %s466_s18, 1  ;;  %p137_p3 = scmp.ne.s32.totalorder %s606_s13, %s602_s12 }
   0x8   : > { %s777_s20 = smov (%p37_p0, %s35_s20), 0  ;;  %p138_p5 = scmp.eq.s32.totalorder %s467_s19, 1 }
   0x9   : > { %p687_p4 = por %p132_p2, %p131_p1  ;;  %s116_s23 = ssub.s32 %s618_s16, %s777_s20 }
   0xa   : > { %p471_p6 = scmp.ge.s32.totalorder %s622_s17, 1  ;;  %p119_p7 = scmp.eq.s32.totalorder %s116_s23, 0 }
   0xb   : > { %p694_p8 = por %p138_p5, %p137_p3  ;;  %p183_p9 = scmp.lt.s32.totalorder %s622_s17, 3 }
   0xc   : > { %s700_s25 = scalar_select %p119_p7, %s610_s14, %s121_s21  }
   0xd   : > { %p184_p10 = pnand %p471_p6, %p183_p9 }
   0xe   : > { %p220_p11 = scmp.lt.s32.totalorder (!%p184_p10), %s614_s15, 1  ;;  %v624_v0 = vmov (!%p184_p10), 0.0   ;;  %v625_v1 = vmov (!%p184_p10), 0   ;;  %v339_v2 = vld [vmem:[%s767_s2] sm:$0xff] (!%p184_p10)  ;;  %vm254_vm0 = vcmask (!%p184_p10), 1043456   ;;  %vm250_vm1 = vcmask (!%p184_p10), 31744  }
   0xf   : > { %187 = sbr.rel (%p184_p10) target bundleno = 260 (0x104), region = 32  ;;  %323 = vmatprep.mubr.f32.mxu0 (!%p184_p10), %v624_v0  ;;  %542 = vset.pattern.permute.xlu0 (!%p184_p10), %v625_v1  ;;  %v246_v5 = vld [vmem:[%s766_s1] sm:$0xff] (!%p184_p10)  ;;  %s216_s8 = sand.u32 (!%p184_p10), 1, %s606_s13  }
  0x10   : > { %342 = vperm.xlu0 (!%p184_p10), %542, %v339_v2   ;;  %s472_s9 = sshll.u32 (!%p184_p10), %s216_s8, 4  ;;  %s484_s10 = sshll.u32 (!%p184_p10), %s614_s15, 8 }
  0x11   : > { %s218_s11 = scalar_lea.vmem (!%p184_p10), [#allocation3], %s472_s9  ;;  %s718_s23 = scalar_lea.hbm (!%p184_p10), %s768_s3, %s484_s10 }
  0x12   : > { %s366_s18 = sshll.u32 (!%p184_p10), %s218_s11, 4  ;;  %s350_s26 = scalar_lea.sflag (!%p184_p10), [#allocation4], %s216_s8  ;;  %s720_s18 = int_to_ptr.vmem [resolvable:$true] %s366_s18 }
  0x13   : > { %s626_s27 = smov (!%p184_p10), [#allocation3]  }
  0x16   : > { %s221_s28 = scalar_select %p220_p11, %s614_s15, 1 }
  0x17   : > { %s544_s15 = scalar_lea.vmem %s720_s18, 256 }
  0x18   : > { %s483_s29 = sshll.u32 %s221_s28, 3  ;;  %p545_p12 = scmp.ne.s32.totalorder %s720_s18, %s544_s15 }
  0x19   : > { %s231_s5 = scalar_lea.vmem %s765_s0, %s483_s29  ;;  %s548_s28 = sshll.u32 %s626_s27, 4  ;;  %s549_s28 = int_to_ptr.vmem [resolvable:$false] %s548_s28 }
  0x1a   : > { %v247_v3 = vld [vmem:[%s231_s5] sm:$0xff]  ;;  %p546_p13 = pnand %p545_p12, %p687_p4  ;;  %s550_s29 = scalar_lea.vmem %s549_s28, 512 }
  0x1b   : > { %v249_v4 = vcombine.high %v247_v3, %v247_v3  ;;  %p551_p1 = scmp.lt.s32.totalorder %s720_s18, %s549_s28  ;;  %p552_p2 = scmp.lt.s32.totalorder %s550_s29, %s544_s15 }
  0x1c   : > { %p547_p0 = pneg %p546_p13 }
  0x1d   : > { %475 = vmatprep.subr.msk.mxu0 %vm254_vm0, %v249_v4  ;;  %p553_p3 = por %p552_p2, %p551_p1 }
  0x1e   : > { %476 = vmatpush1.msk.msra.mxu0 %vm254_vm0, %v247_v3 }
  0x1f   : > { %477 = vmatmul.mubr.msk.f32.vlgmr.msra.gmra.mrb[0].mxu0 %vm250_vm1, %v246_v5  ;;  %p554_p5 = pnand %p553_p3, %p547_p0 }
  0x8f   : > { %v343_v6 = vpop.permute.xlu0 %342 }
  0xf2   : > { %v325_v7 = vpop.f32.mrb[0].mxu0 }
  0xf3   : > { %v345_v8 = vadd.f32 %v343_v6, %v325_v7  ;;  %v327_v9 = vpop.f32.mrb[1].mxu0 }
  0xf4   : > { %v346_v10 = vadd.f32 %v343_v6, %v327_v9 }
  0xf5   : > { %347 = vst [vmem:[%s218_s11] sm:$0xff] %v345_v8 }
  0xf6   : > { %348 = vst [vmem:[%s218_s11 + $0x8] sm:$0xff] %v346_v10 }
  0xf7   : > { %557 = shalt.err (!%p554_p5)
}
  0xf8   : > { %s558_s30 = scalar_lea.hbm %s718_s23, 256  ;;  %s562_s6 = scalar_lea.hbm %s768_s3, 512 }
  0xf9   : > { %p559_p6 = scmp.ne.s32.totalorder %s718_s23, %s558_s30  ;;  %p563_p10 = scmp.lt.u32.totalorder %s718_s23, %s768_s3 }
  0xfa   : > { %p564_p11 = scmp.lt.u32.totalorder %s562_s6, %s558_s30  ;;  %p566_p13 = scmp.lt.u32.totalorder %s558_s30, %s718_s23 }
  0xfb   : > { %p560_p7 = pnand %p559_p6, %p687_p4 }
  0xfc   : > { %p565_p12 = por %p564_p11, %p563_p10 }
  0xfd   : > { %p561_p9 = pneg %p560_p7 }
  0xfe   : > { %p567_p0 = por %p566_p13, %p565_p12 }
 0x100   : > { %p568_p1 = pnand %p567_p0, %p561_p9 }
 0x102   : > { %571 = shalt.err (!%p568_p1)
}
 0x103   : > { %485 = dma.vmem_to_hbm [thread:$0]  (%p687_p4), %s720_s18, 256, %s718_s23, %s350_s26  }
 0x104 PF: > { %p491_p2 = scmp.ge.s32.totalorder %s622_s17, 2  ;;  %s378_s9 = sand.u32 1, %s602_s12  }
 0x105   : > { %s379_s10 = scalar_lea.sflag [#allocation4], %s378_s9 }
 0x106   : > { %p488_p3 = pnand %p491_p2, %p694_p8 }
 0x108   : > { %597 = dma.done.wait (!%p488_p3), %s379_s10, 256  }
 0x109   : > { %599 = vsyncadd (!%p488_p3), %s379_s10, 4294967040  ;;  %s16_s17 = sadd.s32 1, %s622_s17   ;;  %s771_s12 = smov %s606_s13 }
 0x10a   : > { %p13_p5 = scmp.ge.s32.totalorder %s16_s17, 4   ;;  %s772_s13 = smov %s610_s14 }
 0x10b   : > { %s773_s14 = smov %s700_s25  ;;  %s774_s15 = smov %s618_s16 }
 0x10c   : > { %s775_s16 = smov %s777_s20  ;;  %15 = sbr.rel (!%p13_p5) target bundleno = 4 (0x4), region = 78 }
 0x113   :  { %384 = vsyncpa [#allocation4], 1 }
 0x114   :  { %386 = vsyncpa [#allocation4 + $0x1], 1 }

</bundles_post_ra>
